<compile_context>
chip_gen: v5e
topology: v5e:2x2
jax: 0.10.0
libtpu: 0.0.40
codegen_flags: <defaults>
</compile_context>

<pallas_src>
import math

import jax
import jax.numpy as jnp
from jax.experimental import pallas as pl
from jax.experimental.pallas import tpu as pltpu


def _make_pair(x):
    if hasattr(x, "__len__"):
        return tuple(x)
    return (x, x)


def _vmem_budget():
    """(block_budget_bytes, vmem_limit_bytes) — generation aware, v7x safe."""
    try:
        cap = int(pltpu.get_tpu_info().vmem_capacity_bytes)
    except Exception:  # pragma: no cover - conservative fallback
        cap = 64 << 20
    # >=25% headroom off the reported capacity, and never above 48 MiB so the
    # limit stays inside v7x's 64 MiB per-TensorCore VMEM.
    vmem_limit = min(cap * 3 // 4, 48 << 20)
    budget = int(vmem_limit * 0.85)
    return budget, vmem_limit


def _choose_tile_rows(H_out, Wp, C_pad, KKC, C_out, K, out_itemsize, budget,
                      max_rows_per_tile=None):
    """Pick output-row tile TH (and tile count T) so one step fits VMEM."""

    def fits(th):
        tile_l = th * Wp
        band_len = (th + K) * Wp
        need = (2 * C_pad * band_len * 2          # double-buffered bf16 band
                + 2 * C_out * KKC * 2             # (tiny) weight blocks
                + 2 * C_out * tile_l * out_itemsize
                + KKC * tile_l * 2)               # slab scratch (bf16)
        return need <= budget

    if max_rows_per_tile is None and fits(H_out):
        return H_out, 1                            # whole image resident

    # When T > 1 the output block's lane width TH*Wp must be a 128 multiple.
    th_align = 128 // math.gcd(Wp, 128)
    cap = H_out if max_rows_per_tile is None else min(max_rows_per_tile, H_out)
    th = max(th_align, (cap // th_align) * th_align)
    while th > th_align and not fits(th):
        th -= th_align
    # TODO(synk): if even th_align does not fit (gigantic widths), tile the
    #             width as well instead of relying on the VMEM limit.
    T = -(-H_out // th)
    if T == 1:
        return H_out, 1
    return th, T


# ----------------------- fused conv kernel (stride == 1) --------------------
def _sparse_conv2d_fused(x, w_masked, padding, *, max_rows_per_tile=None):
    """Stride-1 conv: one (C_out, K*K*C_pad) @ (K*K*C_pad, TH*Wp) MXU dot per
    (image, row-tile) grid step.  Returns (N, C_out, H_out, W_out) float32."""
    N, C, H, W = x.shape
    C_out, _, K, _ = w_masked.shape
    ph, pw = padding
    Hp, Wp = H + 2 * ph, W + 2 * pw
    H_out, W_out = Hp - K + 1, Wp - K + 1

    C_pad = ((C + 15) // 16) * 16          # bf16 sublane packing (16)
    KKC = K * K * C_pad                    # folded contraction depth

    budget, vmem_limit = _vmem_budget()
    out_itemsize = 2                       # bf16 writeback
    TH, T = _choose_tile_rows(H_out, Wp, C_pad, KKC, C_out, K, out_itemsize,
                              budget, max_rows_per_tile)
    H_out_p = T * TH
    TILE_L = TH * Wp                       # lane-dense "wide" output per tile
    band_rows = TH + K                     # TH output rows + (K-1) halo + 1 spare
    band_len = band_rows * Wp

    # Pad: channels -> C_pad (zero channels are inert), rows so every band's
    # tap slice stays in bounds, cols by pw.
    Hp_tot = H_out_p + K
    bottom = Hp_tot - (H + ph)
    x_p = jnp.pad(x.astype(jnp.bfloat16),
                  ((0, 0), (0, C_pad - C), (ph, bottom), (pw, pw)))
    if T == 1:
        x_bands = x_p.reshape(N, 1, C_pad, band_len)        # free reshape
    else:
        # Banded copy with K-1 halo duplication (only on the large-image path).
        x_bands = jnp.stack(
            [x_p[:, :, t * TH:t * TH + band_rows, :] for t in range(T)],
            axis=1).reshape(N, T, C_pad, band_len)

    # Weight as one lane-dense LHS: w2[o, (kh*K + kw)*C_pad + c] = w[o, c, kh, kw].
    w_p = jnp.pad(w_masked.astype(jnp.bfloat16),
                  ((0, 0), (0, C_pad - C), (0, 0), (0, 0)))
    w2 = jnp.transpose(w_p, (0, 2, 3, 1)).reshape(C_out, KKC)

    def kernel(x_ref, w_ref, o_ref, slab_ref):
        # x_ref:    (1, 1, C_pad, band_len)  bf16 row band, VMEM resident
        # w_ref:    (C_out, KKC)             bf16 folded weights
        # o_ref:    (1, C_out, TILE_L)       bf16 wide output tile
        # slab_ref: (KKC, TILE_L)            bf16 scratch (contraction slab)
        # Build the slab with K*K static lane-offset copies of the band; no
        # whole-image register materialization, no per-tap f32 accumulator adds.
        for kh in range(K):
            for kw in range(K):
                tap = kh * K + kw
                start = kh * Wp + kw
                slab_ref[pl.ds(tap * C_pad, C_pad), :] = (
                    x_ref[0, 0, :, pl.ds(start, TILE_L)])
        # Single MXU contraction over all taps+channels, f32 accumulate.
        o_ref[0] = jnp.dot(w_ref[...], slab_ref[...],
                           preferred_element_type=jnp.float32
                           ).astype(o_ref.dtype)

    flops = 2 * N * C_out * KKC * H_out_p * Wp
    bytes_accessed = (int(x_bands.size) * 2 + int(w2.size) * 2
                      + N * C_out * T * TILE_L * out_itemsize)

    # TODO(synk): when images are tiny (overhead-bound), pack several images per
    #             grid step to amortize the ~0.35us per-step pipeline overhead.
    out_wide = pl.pallas_call(
        kernel,
        out_shape=jax.ShapeDtypeStruct((N, C_out, T * TILE_L), jnp.bfloat16),
        grid_spec=pltpu.PrefetchScalarGridSpec(
            num_scalar_prefetch=0,
            grid=(N, T),
            in_specs=[
                pl.BlockSpec((1, 1, C_pad, band_len), lambda n, t: (n, t, 0, 0)),
                pl.BlockSpec((C_out, KKC), lambda n, t: (0, 0)),
            ],
            out_specs=pl.BlockSpec((1, C_out, TILE_L), lambda n, t: (n, 0, t)),
            scratch_shapes=[pltpu.VMEM((KKC, TILE_L), jnp.bfloat16)],
        ),
        compiler_params=pltpu.CompilerParams(
            dimension_semantics=("parallel", "parallel"),
            vmem_limit_bytes=int(vmem_limit),
        ),
        cost_estimate=pl.CostEstimate(
            flops=int(flops), transcendentals=0,
            bytes_accessed=int(bytes_accessed)),
    )(x_bands, w2)

    # Wide -> NCHW: the f32 upcast rides on the unavoidable width-crop pass.
    out = out_wide.astype(jnp.float32).reshape(N, C_out, H_out_p, Wp)
    return out[:, :, :H_out, :W_out]


# -------------- strided fallback: lane-dense bf16 im2col GEMM ---------------
def _gemm_kernel(w_ref, a_ref, o_ref):
    # w_ref: (C_out, Kd), a_ref: (1, Kd, tm), o_ref: (1, C_out, tm)
    o_ref[0] = jnp.dot(w_ref[...], a_ref[0], preferred_element_type=jnp.float32)


def _sparse_conv2d_im2col(x, w_masked, stride, padding):
    # TODO(synk): fuse the im2col into the kernel (strided pl.ds reads of a
    #             VMEM-resident padded row band) to avoid the K*K activation
    #             blow-up through HBM on the strided path.
    N, C, H, W = x.shape
    C_out, _, K, _ = w_masked.shape
    sh, sw = stride
    ph, pw = padding
    H_out = (H + 2 * ph - K) // sh + 1
    W_out = (W + 2 * pw - K) // sw + 1
    HW = H_out * W_out
    Kd = C * K * K

    x_pad = jnp.pad(x.astype(jnp.bfloat16), ((0, 0), (0, 0), (ph, ph), (pw, pw)))
    cols = []
    for kh in range(K):
        for kw in range(K):
            cols.append(jax.lax.slice(
                x_pad, (0, 0, kh, kw),
                (N, C, kh + (H_out - 1) * sh + 1, kw + (W_out - 1) * sw + 1),
                (1, 1, sh, sw)))
    # (N, C, K*K, H_out, W_out) -> (N, C*K*K, HW): contiguous reshape.
    a = jnp.stack(cols, axis=2).reshape(N, Kd, HW)
    w = w_masked.reshape(C_out, Kd).astype(jnp.bfloat16)

    budget, vmem_limit = _vmem_budget()
    # Big lane-dense tiles (multiple of 128) amortize per-step overhead.
    tm = 2048
    while tm > 128 and (2 * Kd * tm * 2 + 2 * C_out * tm * 4 + 2 * C_out * Kd * 2) > budget:
        tm -= 128
    if HW <= tm:
        tm = HW
    # NOTE: when HW % tm != 0 the last input block reads Pallas block padding
    # past the logical extent; those columns only feed discarded output columns.
    out = pl.pallas_call(
        _gemm_kernel,
        out_shape=jax.ShapeDtypeStruct((N, C_out, HW), jnp.float32),
        grid_spec=pltpu.PrefetchScalarGridSpec(
            num_scalar_prefetch=0,
            grid=(N, pl.cdiv(HW, tm)),
            in_specs=[
                pl.BlockSpec((C_out, Kd), lambda n, i: (0, 0)),
                pl.BlockSpec((1, Kd, tm), lambda n, i: (n, 0, i)),
            ],
            out_specs=pl.BlockSpec((1, C_out, tm), lambda n, i: (n, 0, i)),
        ),
        compiler_params=pltpu.CompilerParams(
            dimension_semantics=("parallel", "parallel"),
            vmem_limit_bytes=int(vmem_limit)),
    )(w, a)
    return out.reshape(N, C_out, H_out, W_out)


# ------------------------------- SparseConv2d --------------------------------
class SparseConv2d:
    """JAX/Pallas port of the PyTorch SparseConv2d module (mask-scaled conv)."""

    def __init__(self, in_channels, out_channels, kernel_size,
                 stride=1, padding=1, *, key=None):
        self.in_channels = in_channels
        self.out_channels = out_channels
        self.kernel_size = kernel_size
        self.stride = _make_pair(stride)
        self.padding = _make_pair(padding)

        if key is None:
            key = jax.random.PRNGKey(0)
        stdv = 1.0 / math.sqrt(in_channels)
        # PyTorch: randn(...) then .uniform_(-stdv, stdv) -> final values uniform.
        self._weight = jax.random.uniform(
            key, (out_channels, in_channels, kernel_size, kernel_size),
            dtype=jnp.float32, minval=-stdv, maxval=stdv)
        self._mask = jnp.ones((out_channels,), dtype=jnp.float32)

    @property
    def weight(self):
        # mask[:, None, None, None] * weight  (elementwise broadcast; glue)
        return self._mask[:, None, None, None] * self._weight

    def __call__(self, x):
        return self.forward(x)

    def forward(self, x):
        # TODO(synk): exploit channel sparsity by gathering only the active
        #             (mask != 0) output-channel rows instead of mask-multiplying.
        w_m = self.weight
        if self.stride == (1, 1):
            return _sparse_conv2d_fused(x, w_m, self.padding)
        return _sparse_conv2d_im2col(x, w_m, self.stride, self.padding)


# ---------------------------------- main -------------------------------------
def _ref_conv(x, w, stride, padding):
    # Reference on the bf16-rounded operands the kernel consumes (f32 accumulate).
    xb = x.astype(jnp.bfloat16).astype(jnp.float32)
    wb = w.astype(jnp.bfloat16).astype(jnp.float32)
    return jax.lax.conv_general_dilated(
        xb, wb, window_strides=stride,
        padding=[(padding[0], padding[0]), (padding[1], padding[1])],
        dimension_numbers=("NCHW", "OIHW", "NCHW"))


if __name__ == "__main__":
    key = jax.random.PRNGKey(0)
    k_x, k_w, k_x2 = jax.random.split(key, 3)

    N, C_in, H, W = 2, 4, 16, 16
    C_out, K = 8, 3

    conv = SparseConv2d(C_in, C_out, K, stride=1, padding=1, key=k_w)

    # --- test 1: fused stride-1 path, whole image resident (T == 1) ---------
    x = jax.random.normal(k_x, (N, C_in, H, W), dtype=jnp.float32)
    y = jax.block_until_ready(conv(x))
    assert y.shape == (N, C_out, H, W), y.shape
    ref = _ref_conv(x, conv.weight, conv.stride, conv.padding)
    err = float(jnp.max(jnp.abs(y - ref)))
    assert jnp.allclose(y, ref, atol=2e-2, rtol=2e-2), err

    # --- test 2: fused path with forced row tiling (T > 1, halo bands) ------
    x2 = jax.random.normal(k_x2, (1, C_in, 20, 126), dtype=jnp.float32)
    y2 = jax.block_until_ready(
        _sparse_conv2d_fused(x2, conv.weight, conv.padding, max_rows_per_tile=8))
    ref2 = _ref_conv(x2, conv.weight, (1, 1), conv.padding)
    assert y2.shape == ref2.shape, (y2.shape, ref2.shape)
    err2 = float(jnp.max(jnp.abs(y2 - ref2)))
    assert jnp.allclose(y2, ref2, atol=2e-2, rtol=2e-2), err2

    # --- test 3: strided fallback (lane-dense GEMM) --------------------------
    conv_s = SparseConv2d(C_in, C_out, K, stride=2, padding=1, key=k_w)
    y3 = jax.block_until_ready(conv_s(x))
    ref3 = _ref_conv(x, conv_s.weight, conv_s.stride, conv_s.padding)
    assert y3.shape == ref3.shape, (y3.shape, ref3.shape)
    err3 = float(jnp.max(jnp.abs(y3 - ref3)))
    assert jnp.allclose(y3, ref3, atol=2e-2, rtol=2e-2), err3

    print("KERNEL_OK")
</pallas_src>

<mosaic_0001>
module attributes {stable_mosaic.version = 11 : i64} {
  func.func @kernel(%arg0: i32, %arg1: i32, %arg2: memref<1x1x16x342xbf16, #tpu.memory_space<vmem>>, %arg3: memref<8x144xbf16, #tpu.memory_space<vmem>>, %arg4: memref<1x8x288xbf16, #tpu.memory_space<vmem>>, %arg5: memref<144x288xbf16, #tpu.memory_space<vmem>>) attributes {dimension_semantics = [#tpu.dimension_semantics<parallel>, #tpu.dimension_semantics<parallel>], iteration_bounds = array<i64: 2, 1>, scalar_prefetch = 0 : i64, scratch_operands = 1 : i64, tpu.core_type = #tpu.core_type<tc>, window_params = [{transform_indices = @transform_0, window_bounds = array<i64: 1, 1, 16, 342>}, {pipeline_mode = #tpu.pipeline_mode<synchronous>, transform_indices = @transform_1, window_bounds = array<i64: 8, 144>}, {transform_indices = @transform_2, window_bounds = array<i64: 1, 8, 288>}]} {
    %c0 = arith.constant 0 : index
    %c0_0 = arith.constant 0 : index
    %c0_1 = arith.constant 0 : index
    %c0_2 = arith.constant 0 : index
    %0 = vector.load %arg2[%c0, %c0_0, %c0_1, %c0_2] : memref<1x1x16x342xbf16, #tpu.memory_space<vmem>>, vector<1x1x16x288xbf16>
    %1 = vector.shape_cast %0 : vector<1x1x16x288xbf16> to vector<16x288xbf16>
    %c0_3 = arith.constant 0 : index
    %c0_4 = arith.constant 0 : index
    %2 = vector.load %arg5[%c0_3, %c0_4] : memref<144x288xbf16, #tpu.memory_space<vmem>>, vector<16x288xbf16>
    tpu.vector_store %arg5[%c0_3, %c0_4], %1 {strides = array<i32>} : memref<144x288xbf16, #tpu.memory_space<vmem>>, vector<16x288xbf16>,
    %c0_5 = arith.constant 0 : index
    %c0_6 = arith.constant 0 : index
    %c0_7 = arith.constant 0 : index
    %c1 = arith.constant 1 : index
    %3 = vector.load %arg2[%c0_5, %c0_6, %c0_7, %c1] : memref<1x1x16x342xbf16, #tpu.memory_space<vmem>>, vector<1x1x16x288xbf16>
    %4 = vector.shape_cast %3 : vector<1x1x16x288xbf16> to vector<16x288xbf16>
    %c16 = arith.constant 16 : index
    %c0_8 = arith.constant 0 : index
    %5 = vector.load %arg5[%c16, %c0_8] : memref<144x288xbf16, #tpu.memory_space<vmem>>, vector<16x288xbf16>
    tpu.vector_store %arg5[%c16, %c0_8], %4 {strides = array<i32>} : memref<144x288xbf16, #tpu.memory_space<vmem>>, vector<16x288xbf16>,
    %c0_9 = arith.constant 0 : index
    %c0_10 = arith.constant 0 : index
    %c0_11 = arith.constant 0 : index
    %c2 = arith.constant 2 : index
    %6 = vector.load %arg2[%c0_9, %c0_10, %c0_11, %c2] : memref<1x1x16x342xbf16, #tpu.memory_space<vmem>>, vector<1x1x16x288xbf16>
    %7 = vector.shape_cast %6 : vector<1x1x16x288xbf16> to vector<16x288xbf16>
    %c32 = arith.constant 32 : index
    %c0_12 = arith.constant 0 : index
    %8 = vector.load %arg5[%c32, %c0_12] : memref<144x288xbf16, #tpu.memory_space<vmem>>, vector<16x288xbf16>
    tpu.vector_store %arg5[%c32, %c0_12], %7 {strides = array<i32>} : memref<144x288xbf16, #tpu.memory_space<vmem>>, vector<16x288xbf16>,
    %c0_13 = arith.constant 0 : index
    %c0_14 = arith.constant 0 : index
    %c0_15 = arith.constant 0 : index
    %c18 = arith.constant 18 : index
    %9 = vector.load %arg2[%c0_13, %c0_14, %c0_15, %c18] : memref<1x1x16x342xbf16, #tpu.memory_space<vmem>>, vector<1x1x16x288xbf16>
    %10 = vector.shape_cast %9 : vector<1x1x16x288xbf16> to vector<16x288xbf16>
    %c48 = arith.constant 48 : index
    %c0_16 = arith.constant 0 : index
    %11 = vector.load %arg5[%c48, %c0_16] : memref<144x288xbf16, #tpu.memory_space<vmem>>, vector<16x288xbf16>
    tpu.vector_store %arg5[%c48, %c0_16], %10 {strides = array<i32>} : memref<144x288xbf16, #tpu.memory_space<vmem>>, vector<16x288xbf16>,
    %c0_17 = arith.constant 0 : index
    %c0_18 = arith.constant 0 : index
    %c0_19 = arith.constant 0 : index
    %c19 = arith.constant 19 : index
    %12 = vector.load %arg2[%c0_17, %c0_18, %c0_19, %c19] : memref<1x1x16x342xbf16, #tpu.memory_space<vmem>>, vector<1x1x16x288xbf16>
    %13 = vector.shape_cast %12 : vector<1x1x16x288xbf16> to vector<16x288xbf16>
    %c64 = arith.constant 64 : index
    %c0_20 = arith.constant 0 : index
    %14 = vector.load %arg5[%c64, %c0_20] : memref<144x288xbf16, #tpu.memory_space<vmem>>, vector<16x288xbf16>
    tpu.vector_store %arg5[%c64, %c0_20], %13 {strides = array<i32>} : memref<144x288xbf16, #tpu.memory_space<vmem>>, vector<16x288xbf16>,
    %c0_21 = arith.constant 0 : index
    %c0_22 = arith.constant 0 : index
    %c0_23 = arith.constant 0 : index
    %c20 = arith.constant 20 : index
    %15 = vector.load %arg2[%c0_21, %c0_22, %c0_23, %c20] : memref<1x1x16x342xbf16, #tpu.memory_space<vmem>>, vector<1x1x16x288xbf16>
    %16 = vector.shape_cast %15 : vector<1x1x16x288xbf16> to vector<16x288xbf16>
    %c80 = arith.constant 80 : index
    %c0_24 = arith.constant 0 : index
    %17 = vector.load %arg5[%c80, %c0_24] : memref<144x288xbf16, #tpu.memory_space<vmem>>, vector<16x288xbf16>
    tpu.vector_store %arg5[%c80, %c0_24], %16 {strides = array<i32>} : memref<144x288xbf16, #tpu.memory_space<vmem>>, vector<16x288xbf16>,
    %c0_25 = arith.constant 0 : index
    %c0_26 = arith.constant 0 : index
    %c0_27 = arith.constant 0 : index
    %c36 = arith.constant 36 : index
    %18 = vector.load %arg2[%c0_25, %c0_26, %c0_27, %c36] : memref<1x1x16x342xbf16, #tpu.memory_space<vmem>>, vector<1x1x16x288xbf16>
    %19 = vector.shape_cast %18 : vector<1x1x16x288xbf16> to vector<16x288xbf16>
    %c96 = arith.constant 96 : index
    %c0_28 = arith.constant 0 : index
    %20 = vector.load %arg5[%c96, %c0_28] : memref<144x288xbf16, #tpu.memory_space<vmem>>, vector<16x288xbf16>
    tpu.vector_store %arg5[%c96, %c0_28], %19 {strides = array<i32>} : memref<144x288xbf16, #tpu.memory_space<vmem>>, vector<16x288xbf16>,
    %c0_29 = arith.constant 0 : index
    %c0_30 = arith.constant 0 : index
    %c0_31 = arith.constant 0 : index
    %c37 = arith.constant 37 : index
    %21 = vector.load %arg2[%c0_29, %c0_30, %c0_31, %c37] : memref<1x1x16x342xbf16, #tpu.memory_space<vmem>>, vector<1x1x16x288xbf16>
    %22 = vector.shape_cast %21 : vector<1x1x16x288xbf16> to vector<16x288xbf16>
    %c112 = arith.constant 112 : index
    %c0_32 = arith.constant 0 : index
    %23 = vector.load %arg5[%c112, %c0_32] : memref<144x288xbf16, #tpu.memory_space<vmem>>, vector<16x288xbf16>
    tpu.vector_store %arg5[%c112, %c0_32], %22 {strides = array<i32>} : memref<144x288xbf16, #tpu.memory_space<vmem>>, vector<16x288xbf16>,
    %c0_33 = arith.constant 0 : index
    %c0_34 = arith.constant 0 : index
    %c0_35 = arith.constant 0 : index
    %c38 = arith.constant 38 : index
    %24 = vector.load %arg2[%c0_33, %c0_34, %c0_35, %c38] : memref<1x1x16x342xbf16, #tpu.memory_space<vmem>>, vector<1x1x16x288xbf16>
    %25 = vector.shape_cast %24 : vector<1x1x16x288xbf16> to vector<16x288xbf16>
    %c128 = arith.constant 128 : index
    %c0_36 = arith.constant 0 : index
    %26 = vector.load %arg5[%c128, %c0_36] : memref<144x288xbf16, #tpu.memory_space<vmem>>, vector<16x288xbf16>
    tpu.vector_store %arg5[%c128, %c0_36], %25 {strides = array<i32>} : memref<144x288xbf16, #tpu.memory_space<vmem>>, vector<16x288xbf16>,
    %c0_37 = arith.constant 0 : index
    %c0_38 = arith.constant 0 : index
    %27 = vector.load %arg3[%c0_37, %c0_38] : memref<8x144xbf16, #tpu.memory_space<vmem>>, vector<8x144xbf16>
    %c0_39 = arith.constant 0 : index
    %c0_40 = arith.constant 0 : index
    %28 = vector.load %arg5[%c0_39, %c0_40] : memref<144x288xbf16, #tpu.memory_space<vmem>>, vector<144x288xbf16>
    %cst = arith.constant dense<0.000000e+00> : vector<8x288xf32>
    %29 = tpu.matmul %27, %28, %cst {dimension_numbers = #tpu.dot_dimension_numbers<[1], [0], [0], [1], [0, 0, 1, 1], [], []>} : vector<8x144xbf16>, vector<144x288xbf16>, vector<8x288xf32> -> vector<8x288xf32>
    %30 = arith.truncf %29 : vector<8x288xf32> to vector<8x288xbf16>
    %c0_41 = arith.constant 0 : index
    %c0_42 = arith.constant 0 : index
    %c0_43 = arith.constant 0 : index
    %31 = vector.load %arg4[%c0_41, %c0_42, %c0_43] : memref<1x8x288xbf16, #tpu.memory_space<vmem>>, vector<1x8x288xbf16>
    %32 = vector.shape_cast %31 : vector<1x8x288xbf16> to vector<8x288xbf16>
    %33 = vector.shape_cast %30 : vector<8x288xbf16> to vector<1x8x288xbf16>
    tpu.vector_store %arg4[%c0_41, %c0_42, %c0_43], %33 {strides = array<i32>} : memref<1x8x288xbf16, #tpu.memory_space<vmem>>, vector<1x8x288xbf16>,
    return
  }
  func.func @transform_0(%arg0: i32, %arg1: i32) -> (i32, i32, i32, i32) {
    %c0_i32 = arith.constant 0 : i32
    %c0_i32_0 = arith.constant 0 : i32
    %c0_i32_1 = arith.constant 0 : i32
    return %arg0, %arg1, %c0_i32, %c0_i32_0 : i32, i32, i32, i32
  }
  func.func @transform_1(%arg0: i32, %arg1: i32) -> (i32, i32) {
    %c0_i32 = arith.constant 0 : i32
    %c0_i32_0 = arith.constant 0 : i32
    %c0_i32_1 = arith.constant 0 : i32
    return %c0_i32, %c0_i32_0 : i32, i32
  }
  func.func @transform_2(%arg0: i32, %arg1: i32) -> (i32, i32, i32) {
    %c0_i32 = arith.constant 0 : i32
    %c0_i32_0 = arith.constant 0 : i32
    return %arg0, %c0_i32, %arg1 : i32, i32, i32
  }
}

</mosaic_0001>

<bundles_post_ra>
// kernel: tpu_custom_call.1
= control target key start
LH: loop header
LB: loop body
LE: loop exit
PB: predicated region body
PF: predicated region fallthrough
CT: control target
= control target key end

     0   :  { %7 = vsyncpa [#allocation4], 0  ;;  %s1525_s0 = inlined_call_operand.hbm [shape: bf16[2,1,16,342], index: 0, kind: input, shape index: {}]   ;;  %s1526_s1 = inlined_call_operand.hbm [shape: bf16[8,144], index: 1, kind: input, shape index: {}]   ;;  %s1527_s2 = inlined_call_operand.hbm [shape: bf16[2,8,288], index: 2, kind: output, shape index: {}]  }
   0x1   :  { %9 = vsyncpa [#allocation4 + $0x1], 0 }
   0x2   :  { %10 = vsyncpa [#allocation7], 0 }
   0x3   :  { %11 = vsyncpa [#allocation5], 0 }
   0x4   :  { %13 = vsyncpa [#allocation5 + $0x1], 0  ;;  %s1270_s9 = smov 0   ;;  %s1272_s10 = smov 0  }
   0x5   :  { %s1274_s11 = smov 0   ;;  %s1276_s12 = smov 0  }
   0x6   :  { %s1278_s13 = smov 0   ;;  %s1280_s14 = smov 0  }
   0x7 LB: > { %s859_s15 = sadd.s32 4294967295, %s1242_s14   ;;  %s860_s16 = sadd.s32 4294967294, %s1242_s14   ;;  %s1242_s14 = sphi %s1280_s14, %s19_s14   ;;  %s1238_s13 = sphi %s1278_s13, %s1539_s13   ;;  %s1234_s12 = sphi %s1276_s12, %s1538_s12   ;;  %s1230_s11 = sphi %s1274_s11, %s1537_s11   ;;  %s1226_s10 = sphi %s1272_s10, %s1536_s10   ;;  %s1222_s9 = sphi %s1270_s9, %s1535_s9  }
   0x8   : > { %s40_s17 = sadd.s32 1, %s1230_s11  ;;  %p47_p0 = scmp.ne.s32.totalorder %s1230_s11, %s1226_s10 }
   0x9   : > { %p48_p1 = scmp.eq.s32.totalorder %s1242_s14, 0  ;;  %p53_p2 = scmp.ne.s32.totalorder %s1226_s10, %s1222_s9 }
   0xa   : > { %p1308_p3 = scmp.eq.s32.totalorder %s859_s15, 0  ;;  %p100_p4 = scmp.eq.s32.totalorder %s859_s15, 1 }
   0xb   : > { %p1312_p5 = por %p48_p1, %p47_p0  ;;  %p106_p6 = scmp.eq.s32.totalorder %s860_s16, 1 }
   0xc   : > { %p1318_p7 = por %p1308_p3, %p53_p2  ;;  %p1322_p8 = por %p100_p4, %p47_p0 }
   0xd   : > { %p1326_p9 = por %p106_p6, %p53_p2  ;;  %p861_p10 = scmp.ge.s32.totalorder %s1242_s14, 1 }
   0xe   : > { %p113_p11 = scmp.lt.s32.totalorder %s1242_s14, 3  ;;  %s125_s25 = sshll.u32 %s1526_s1, 4  ;;  %s126_s25 = int_to_ptr.hbm [resolvable:$true] %s125_s25 }
   0xf   : > { %s1244_s27 = smov [#allocation6]   ;;  %p863_p13 = scmp.ge.s32.totalorder %s1242_s14, 2 }
  0x10   : > { %p1335_p12 = pnand %p861_p10, %p113_p11  ;;  %s127_s28 = sshll.u32 %s1244_s27, 4  ;;  %s128_s28 = int_to_ptr.vmem [resolvable:$true] %s127_s28 }
  0x11   : > { %p1034_p1 = scmp.lt.s32.totalorder %s1242_s14, 2  ;;  %s31_s30 = sadd.s32 1, %s1238_s13 }
  0x12   : > { %p1021_p0 = pneg %p1335_p12  ;;  %p33_p6 = scmp.ge.s32.totalorder %s31_s30, 2 }
  0x13   : > { %p1347_p4 = pnand %p1034_p1, %p1312_p5  ;;  %s138_s3 = sand.u32 1, %s1230_s11  }
  0x14   : > { %p1022_p2 = pnand %p1021_p0, %p1308_p3  ;;  %s1541_s30 = smov (%p33_p6, %s31_s30), 0 }
  0x15   : > { %s1008_s4 = smul.u32 24, %s138_s3  ;;  %s35_s5 = ssub.s32 %s1238_s13, %s1541_s30 }
  0x16   : > { %1024 = dma.hbm_to_vmem [thread:$0]  (!%p1022_p2), %s126_s25, 128, %s128_s28, [#allocation7]  }
  0x17   : > { %s1009_s6 = smul.u32 24, %s1238_s13  ;;  %p38_p10 = scmp.eq.s32.totalorder %s35_s5, 0 }
  0x18   : > { %s142_s16 = scalar_lea.vmem [#allocation3], %s1008_s4  ;;  %s139_s25 = scalar_lea.sflag [#allocation4], %s138_s3 }
  0x19   : > { %s149_s15 = scalar_lea.hbm %s1525_s0, %s1009_s6  ;;  %s152_s19 = sshll.u32 %s142_s16, 4  ;;  %s153_s19 = int_to_ptr.vmem [resolvable:$true] %s152_s19 }
  0x1a   : > { %s1364_s23 = scalar_select %p38_p10, %s1230_s11, %s40_s17  }
  0x1b   : > { %s150_s24 = sshll.u32 %s149_s15, 4  ;;  %s1245_s27 = smov 192   ;;  %s151_s24 = int_to_ptr.hbm [resolvable:$true] %s150_s24 }
  0x1c   : > { %s1246_s28 = smov 12   ;;  %164 = sbr.rel (%p1335_p12) target bundleno = 394 (0x18a), region = 28 }
  0x1d   : > { %1028 = dma.hbm_to_vmem [thread:$0]  (!%p1347_p4), %s151_s24, 384, %s153_s19, %s139_s25, %s1245_s27, %s1245_s27, %s1246_s28  }
  0x1e   : > { %s1371_s5 = sand.u32 (!%p1335_p12), 1, %s1226_s10  }
  0x1f   : > { %s1010_s4 = smul.u32 (!%p1335_p12), 24, %s1371_s5  ;;  %s167_s17 = scalar_lea.sflag (!%p1335_p12), [#allocation4], %s1371_s5 }
  0x21   : > { %s1375_s6 = scalar_lea.vmem [#allocation3], %s1010_s4 }
  0x22   : > { %1209 = dma.done.wait (%p1318_p7), %s167_s17, 384  }
  0x23   : > { %1211 = vsyncadd (%p1318_p7), %s167_s17, 4294966912 }
  0x24   : > { %1213 = dma.done.wait (%p1308_p3), [#allocation7], 128  }
  0x25   : > { %1215 = vsyncadd (%p1308_p3), [#allocation7], 4294967168  ;;  %v409_v0 = vld [vmem:[%s1375_s6 + $0xc] sm:$0xff]  ;;  %v407_v1 = vld [vmem:[%s1375_s6] sm:$0xff]  ;;  %s1247_s26 = smov 91   ;;  %s1248_s20 = smov 92  }
  0x26   : > { %419 = vrot.lane.b32.xlu1 %v409_v0, %s1247_s26  ;;  %415 = vrot.lane.b32.xlu0 %v407_v1, %s1247_s26  ;;  %203 = vst [vmem:[#allocation2] sm:$0xff] %v407_v1  ;;  %v410_v2 = vld [vmem:[%s1375_s6 + $0x14] sm:$0xf]  ;;  %v408_v3 = vld [vmem:[%s1375_s6 + $0x8] sm:$0xf]  ;;  %s1249_s18 = smov 108  }
  0x27   : > { %382 = vrot.lane.b32.xlu2 %v407_v1, %s1248_s20  ;;  %206 = vst [vmem:[#allocation2 + $0xc] sm:$0xff] %v409_v0  ;;  %v375_v4 = vld [vmem:[%s1375_s6 + $0x8] sm:$0xf]  ;;  %v377_v5 = vld [vmem:[%s1375_s6 + $0x14] sm:$0xf]  ;;  %s1250_s29 = smov 109  }
  0x28   : > { %v342_v6 = vld [vmem:[%s1375_s6 + $0x8] sm:$0xf]  ;;  %v344_v7 = vld [vmem:[%s1375_s6 + $0x14] sm:$0xf]  ;;  %s1251_s3 = smov 90   ;;  %s1252_s7 = smov 110  }
  0x29   : > { %v309_v8 = vld [vmem:[%s1375_s6 + $0x8] sm:$0xf]  ;;  %v311_v9 = vld [vmem:[%s1375_s6 + $0x14] sm:$0xf]  ;;  %s1253_s8 = smov 126   ;;  %s1254_s15 = smov 127  }
  0x2a   : > { %v441_v10 = vld [vmem:[%s1375_s6 + $0x8] sm:$0xf]  ;;  %v443_v11 = vld [vmem:[%s1375_s6 + $0x14] sm:$0xf]  ;;  %vm204_vm0 = vcmask 257024   ;;  %vm228_vm1 = vcmask 1043456  }
  0x2b   : > { %v276_v12 = vld [vmem:[%s1375_s6 + $0x8] sm:$0xf]  ;;  %v278_v13 = vld [vmem:[%s1375_s6 + $0x14] sm:$0xf]  ;;  %vm395_vm2 = vcmask 752640   ;;  %vm428_vm3 = vcmask 744448  }
  0x2c   : > { %v243_v14 = vld [vmem:[%s1375_s6 + $0x8] sm:$0xf]  ;;  %v245_v15 = vld [vmem:[%s1375_s6 + $0x14] sm:$0xf]  ;;  %vm362_vm4 = vcmask 883712   ;;  %vm329_vm5 = vcmask 891904  }
  0x2d   : > { %v209_v16 = vld [vmem:[%s1375_s6 + $0x8] sm:$0xf]  ;;  %v211_v17 = vld [vmem:[%s1375_s6 + $0x14] sm:$0xf]  ;;  %vm461_vm6 = vcmask 736256   ;;  %vm296_vm7 = vcmask 900096  }
  0x2e   : > { %421 = vrot.lane.b32.xlu1 %v410_v2, %s1247_s26  ;;  %417 = vrot.lane.b32.xlu0 %v408_v3, %s1247_s26  ;;  %vm660_vm8 = vcmask 130048   ;;  %vm263_vm9 = vcmask 1031168   ;;  %vm230_vm10 = vcmask 1039360   ;;  %s1011_s16 = smul.u32 12, %s1371_s5 }
  0x2f   : > { %384 = vrot.lane.b32.xlu2 %v375_v4, %s1248_s20  ;;  %s1012_s19 = smul.u32 12, %s1234_s12  ;;  %s747_s12 = scalar_lea.sflag [#allocation5], %s1371_s5 }
  0x30   : > { %s196_s24 = scalar_lea.vmem [#allocation8], %s1011_s16 }
  0x31   : > { %s760_s28 = scalar_lea.hbm %s1527_s2, %s1012_s19  ;;  %s762_s4 = sshll.u32 %s196_s24, 4  ;;  %s763_s4 = int_to_ptr.vmem [resolvable:$true] %s762_s4 }
  0x32   : > { %s764_s17 = sshll.u32 %s760_s28, 4  ;;  %s765_s17 = int_to_ptr.hbm [resolvable:$true] %s764_s17 }
  0x36   : > { %388 = vrot.lane.b32.xlu1 %v377_v5, %s1248_s20  ;;  %386 = vrot.lane.b32.xlu0 %v409_v0, %s1248_s20 }
  0x37   : > { %349 = vrot.lane.b32.xlu2 %v407_v1, %s1249_s18 }
  0x3e   : > { %353 = vrot.lane.b32.xlu1 %v409_v0, %s1249_s18  ;;  %351 = vrot.lane.b32.xlu0 %v342_v6, %s1249_s18 }
  0x3f   : > { %355 = vrot.lane.b32.xlu2 %v344_v7, %s1249_s18 }
  0x46   : > { %318 = vrot.lane.b32.xlu1 %v309_v8, %s1250_s29  ;;  %316 = vrot.lane.b32.xlu0 %v407_v1, %s1250_s29 }
  0x47   : > { %320 = vrot.lane.b32.xlu2 %v409_v0, %s1250_s29 }
  0x4e   : > { %448 = vrot.lane.b32.xlu1 %v407_v1, %s1251_s3  ;;  %322 = vrot.lane.b32.xlu0 %v311_v9, %s1250_s29  ;;  %s1176_s29 = scalar_lea.hbm %s1527_s2, 24 }
  0x4f   : > { %450 = vrot.lane.b32.xlu2 %v441_v10, %s1251_s3 }
  0x56   : > { %454 = vrot.lane.b32.xlu1 %v443_v11, %s1251_s3  ;;  %452 = vrot.lane.b32.xlu0 %v409_v0, %s1251_s3 }
  0x57   : > { %283 = vrot.lane.b32.xlu2 %v407_v1, %s1252_s7 }
  0x5e   : > { %287 = vrot.lane.b32.xlu1 %v409_v0, %s1252_s7  ;;  %285 = vrot.lane.b32.xlu0 %v276_v12, %s1252_s7 }
  0x5f   : > { %289 = vrot.lane.b32.xlu2 %v278_v13, %s1252_s7 }
  0x66   : > { %252 = vrot.lane.b32.xlu1 %v243_v14, %s1253_s8  ;;  %250 = vrot.lane.b32.xlu0 %v407_v1, %s1253_s8 }
  0x67   : > { %254 = vrot.lane.b32.xlu2 %v409_v0, %s1253_s8 }
  0x6e   : > { %256 = vrot.lane.b32.xlu0 %v245_v15, %s1253_s8  ;;  %216 = vrot.lane.b32.xlu1 %v407_v1, %s1254_s15 }
  0x6f   : > { %218 = vrot.lane.b32.xlu2 %v209_v16, %s1254_s15 }
  0x76   : > { %220 = vrot.lane.b32.xlu0 %v409_v0, %s1254_s15  ;;  %222 = vrot.lane.b32.xlu1 %v211_v17, %s1254_s15 }
  0x81   : > { %v383_v18 = vpop.permute.xlu2 %382 }
  0x82   : > { %v390_v19 = vrot.slane %v383_v18, 4 }
  0x89   : > { %v385_v20 = vpop.permute.xlu2 %384 }
  0x8a   : > { %v391_v21 = vrot.slane %v385_v20, 4  ;;  %404 = vst.msk [vmem:[#allocation2 + $0x98] sm:$0xf] %vm204_vm0, %v385_v20 }
  0x8c   : > { %v394_v22 = vsel %vm228_vm1, %v390_v19, %v391_v21 }
  0x8d   : > { %v396_v23 = vsel %vm395_vm2, %v383_v18, %v394_v22 }
  0x8e   : > { %403 = vst [vmem:[#allocation2 + $0x90] sm:$0xff] %v396_v23 }
  0x91   : > { %v350_v24 = vpop.permute.xlu2 %349 }
  0x92   : > { %v357_v52 = vrot.slane %v350_v24, 4 }
  0x95   : > { %v941_v61 = vld [vmem:[#allocation2 + $0x90] sm:$0xf]  ;;  %v999_v1 = vld [vmem:[#allocation2 + $0x94] sm:$0xf] }
  0x98   : > { %v420_v25 = vpop.permute.xlu1 %419  ;;  %v416_v26 = vpop.permute.xlu0 %415 }
  0x99   : > { %v356_v27 = vpop.permute.xlu2 %355  ;;  %v425_v30 = vrot.slane %v420_v25, 4  ;;  %v423_v31 = vrot.slane %v416_v26, 4 }
  0x9a   : > { %373 = vst.msk [vmem:[#allocation2 + $0x8c] sm:$0xf] %vm204_vm0, %v356_v27  ;;  %v360_v53 = vrot.slane %v356_v27, 4 }
  0xa0   : > { %v422_v28 = vpop.permute.xlu1 %421  ;;  %v418_v29 = vpop.permute.xlu0 %417 }
  0xa1   : > { %v426_v32 = vrot.slane %v422_v28, 4  ;;  %439 = vst.msk [vmem:[#allocation2 + $0xbc] sm:$0xf] %vm204_vm0, %v422_v28  ;;  %v424_v33 = vrot.slane %v418_v29, 4  ;;  %v1408_v34 = vpop.permute.xlu2 %320 }
  0xa2   : > { %437 = vst.msk [vmem:[#allocation2 + $0xb0] sm:$0xf] %vm204_vm0, %v418_v29  ;;  %v326_v18 = vrot.slane %v1408_v34, 4 }
  0xa3   : > { %v430_v35 = vsel %vm228_vm1, %v425_v30, %v426_v32  ;;  %v427_v36 = vsel %vm228_vm1, %v423_v31, %v424_v33 }
  0xa4   : > { %v431_v37 = vsel %vm428_vm3, %v420_v25, %v430_v35  ;;  %v429_v38 = vsel %vm428_vm3, %v416_v26, %v427_v36 }
  0xa5   : > { %438 = vst [vmem:[#allocation2 + $0xb4] sm:$0xff] %v431_v37 }
  0xa6   : > { %436 = vst [vmem:[#allocation2 + $0xa8] sm:$0xff] %v429_v38 }
  0xa8   : > { %v389_v39 = vpop.permute.xlu1 %388  ;;  %v387_v40 = vpop.permute.xlu0 %386 }
  0xa9   : > { %v393_v41 = vrot.slane %v389_v39, 4  ;;  %406 = vst.msk [vmem:[#allocation2 + $0xa4] sm:$0xf] %vm204_vm0, %v389_v39  ;;  %v392_v42 = vrot.slane %v387_v40, 4  ;;  %v1414_v43 = vpop.permute.xlu2 %450 }
  0xaa   : > { %470 = vst.msk [vmem:[#allocation2 + $0xc8] sm:$0xf] %vm204_vm0, %v1414_v43  ;;  %v457_v19 = vrot.slane %v1414_v43, 4 }
  0xab   : > { %v397_v44 = vsel %vm228_vm1, %v392_v42, %v393_v41 }
  0xac   : > { %v398_v45 = vsel %vm395_vm2, %v387_v40, %v397_v44  ;;  %v1003_v46 = vld [vmem:[#allocation2 + $0xb0] sm:$0xf0]  ;;  %v955_v47 = vld [vmem:[#allocation2 + $0xb4] sm:$0xf0]  ;;  %v1451_v44 = vld [vmem:[#allocation6] sm:$0xff] }
  0xad   : > { %405 = vst [vmem:[#allocation2 + $0x9c] sm:$0xff] %v398_v45  ;;  %v953_v48 = vld [vmem:[#allocation2 + $0xa8] sm:$0xf]  ;;  %v1002_v49 = vld [vmem:[#allocation2 + $0xac] sm:$0xf] }
  0xae   : > { %v954_v50 = vor.u32 %v1003_v46, %v953_v48  ;;  %v958_v51 = vor.u32 %v1002_v49, %v955_v47  ;;  %v200_v45 = vld [vmem:[%s1375_s6 + $0x8] sm:$0xf]  ;;  %v202_v46 = vld [vmem:[%s1375_s6 + $0x14] sm:$0xf]  ;;  %s1170_s6 = sshra.s32 %s765_s17, 4  ;;  %s1171_s6 = int_to_ptr.hbm [resolvable:$true] %s1170_s6 }
  0xaf   : > { %205 = vst.msk [vmem:[#allocation2 + $0x8] sm:$0xf] %vm204_vm0, %v200_v45  ;;  %s1172_s26 = scalar_lea.hbm %s1171_s6, 12  ;;  %p1177_p11 = scmp.lt.s32.totalorder %s1171_s6, %s1527_s2 }
  0xb0   : > { %664 = vmatpush.bf16.msra.mxu0 %v954_v50  ;;  %690 = vmatpush.bf16.msra.mxu2 %v958_v51  ;;  %v354_v54 = vpop.permute.xlu1 %353  ;;  %v352_v55 = vpop.permute.xlu0 %351  ;;  %v961_v51 = vld [vmem:[#allocation2 + $0xb0] sm:$0xf]  ;;  %207 = vst.msk [vmem:[#allocation2 + $0x14] sm:$0xf] %vm204_vm0, %v202_v46  ;;  %p1173_p3 = scmp.ne.s32.totalorder %s1171_s6, %s1172_s26  ;;  %p1178_p12 = scmp.lt.s32.totalorder %s1176_s29, %s1172_s26 }
  0xb1   : > { %v359_v56 = vrot.slane %v354_v54, 4  ;;  %v358_v57 = vrot.slane %v352_v55, 4  ;;  %371 = vst.msk [vmem:[#allocation2 + $0x80] sm:$0xf] %vm204_vm0, %v352_v55  ;;  %v1421_v58 = vpop.permute.xlu2 %283 }
  0xb2   : > { %v291_v40 = vrot.slane %v1421_v58, 4  ;;  %p1174_p5 = pnand %p1173_p3, %p1322_p8  ;;  %p1179_p0 = por %p1178_p12, %p1177_p11 }
  0xb3   : > { %v361_v59 = vsel %vm228_vm1, %v357_v52, %v358_v57  ;;  %v364_v60 = vsel %vm228_vm1, %v359_v56, %v360_v53  ;;  %v1004_v52 = vld [vmem:[#allocation2 + $0xb8] sm:$0xf0]  ;;  %v512_v53 = vunpack.c.h.b16 %v1451_v44  ;;  %v973_v57 = vld [vmem:[#allocation2 + $0xc8] sm:$0xf] }
  0xb4   : > { %v363_v62 = vsel %vm362_vm4, %v350_v24, %v361_v59  ;;  %v365_v63 = vsel %vm362_vm4, %v354_v54, %v364_v60  ;;  %v1000_v0 = vld [vmem:[#allocation2 + $0x98] sm:$0xf0]  ;;  %v943_v2 = vld [vmem:[#allocation2 + $0x9c] sm:$0xf0]  ;;  %p1175_p7 = pneg %p1174_p5 }
  0xb5   : > { %370 = vst [vmem:[#allocation2 + $0x78] sm:$0xff] %v363_v62  ;;  %v942_v3 = vor.u32 %v1000_v0, %v941_v61  ;;  %v946_v4 = vor.u32 %v999_v1, %v943_v2 }
  0xb6   : > { %372 = vst [vmem:[#allocation2 + $0x84] sm:$0xff] %v365_v63  ;;  %p1180_p1 = pnand %p1179_p0, %p1175_p7 }
  0xb7   : > { %665 = vmatpush.bf16.msra.mxu0 %v942_v3  ;;  %691 = vmatpush.bf16.msra.mxu2 %v946_v4  ;;  %v962_v3 = vor.u32 %v1004_v52, %v961_v51 }
  0xb8   : > { %v319_v5 = vpop.permute.xlu1 %318  ;;  %v317_v6 = vpop.permute.xlu0 %316 }
  0xb9   : > { %v325_v7 = vrot.slane %v319_v5, 4  ;;  %338 = vst.msk [vmem:[#allocation2 + $0x68] sm:$0xf] %vm204_vm0, %v319_v5  ;;  %v324_v8 = vrot.slane %v317_v6, 4  ;;  %v1426_v9 = vpop.permute.xlu2 %289  ;;  %v1462_v5 = vpack.c.b16 %v512_v53, %v512_v53 }
  0xba   : > { %307 = vst.msk [vmem:[#allocation2 + $0x5c] sm:$0xf] %vm204_vm0, %v1426_v9  ;;  %v294_v43 = vrot.slane %v1426_v9, 4 }
  0xbb   : > { %v328_v10 = vsel %vm228_vm1, %v324_v8, %v325_v7  ;;  %v1001_v7 = vld [vmem:[#allocation2 + $0xa0] sm:$0xf0] }
  0xbc   : > { %v330_v11 = vsel %vm329_vm5, %v317_v6, %v328_v10  ;;  %v929_v12 = vld [vmem:[#allocation2 + $0x78] sm:$0xf]  ;;  %v996_v13 = vld [vmem:[#allocation2 + $0x7c] sm:$0xf] }
  0xbd   : > { %337 = vst [vmem:[#allocation2 + $0x60] sm:$0xff] %v330_v11  ;;  %v997_v14 = vld [vmem:[#allocation2 + $0x80] sm:$0xf0]  ;;  %v931_v15 = vld [vmem:[#allocation2 + $0x84] sm:$0xf0] }
  0xbe   : > { %v930_v16 = vor.u32 %v997_v14, %v929_v12  ;;  %v934_v17 = vor.u32 %v996_v13, %v931_v15  ;;  %v949_v6 = vld [vmem:[#allocation2 + $0x98] sm:$0xf]  ;;  %v998_v13 = vld [vmem:[#allocation2 + $0x88] sm:$0xf0] }
  0xbf   : > { %v950_v11 = vor.u32 %v1001_v7, %v949_v6  ;;  %v511_v6 = vunpack.c.l.b16 %v1451_v44 }
  0xc0   : > { %666 = vmatpush.bf16.msra.mxu0 %v930_v16  ;;  %692 = vmatpush.bf16.msra.mxu2 %v934_v17  ;;  %v449_v20 = vpop.permute.xlu1 %448  ;;  %v323_v21 = vpop.permute.xlu0 %322  ;;  %v937_v17 = vld [vmem:[#allocation2 + $0x80] sm:$0xf] }
  0xc1   : > { %v456_v22 = vrot.slane %v449_v20, 4  ;;  %v327_v23 = vrot.slane %v323_v21, 4  ;;  %340 = vst.msk [vmem:[#allocation2 + $0x74] sm:$0xf] %vm204_vm0, %v323_v21  ;;  %v1435_v24 = vpop.permute.xlu2 %254 }
  0xc3   : > { %v460_v25 = vsel %vm228_vm1, %v456_v22, %v457_v19  ;;  %v331_v26 = vsel %vm228_vm1, %v326_v18, %v327_v23  ;;  %v260_v22 = vrot.slane %v1435_v24, 4  ;;  %v938_v23 = vor.u32 %v998_v13, %v937_v17 }
  0xc4   : > { %v462_v27 = vsel %vm461_vm6, %v449_v20, %v460_v25  ;;  %v332_v28 = vsel %vm329_vm5, %v1408_v34, %v331_v26  ;;  %v917_v34 = vld [vmem:[#allocation2 + $0x60] sm:$0xf]  ;;  %v993_v37 = vld [vmem:[#allocation2 + $0x64] sm:$0xf] }
  0xc5   : > { %469 = vst [vmem:[#allocation2 + $0xc0] sm:$0xff] %v462_v27 }
  0xc6   : > { %339 = vst [vmem:[#allocation2 + $0x6c] sm:$0xff] %v332_v28 }
  0xc8   : > { %v455_v29 = vpop.permute.xlu1 %454  ;;  %v453_v30 = vpop.permute.xlu0 %452  ;;  %v995_v28 = vld [vmem:[#allocation2 + $0x70] sm:$0xf0] }
  0xc9   : > { %v459_v31 = vrot.slane %v455_v29, 4  ;;  %472 = vst.msk [vmem:[#allocation2 + $0xd4] sm:$0xf] %vm204_vm0, %v455_v29  ;;  %v458_v32 = vrot.slane %v453_v30, 4  ;;  %v1443_v33 = vpop.permute.xlu2 %218 }
  0xca   : > { %239 = vst.msk [vmem:[#allocation2 + $0x20] sm:$0xf] %vm204_vm0, %v1443_v33  ;;  %v225_v25 = vrot.slane %v1443_v33, 4 }
  0xcb   : > { %v463_v35 = vsel %vm228_vm1, %v458_v32, %v459_v31  ;;  %v925_v31 = vld [vmem:[#allocation2 + $0x68] sm:$0xf] }
  0xcc   : > { %v464_v36 = vsel %vm461_vm6, %v453_v30, %v463_v35  ;;  %v965_v56 = vld [vmem:[#allocation2 + $0xc0] sm:$0xf]  ;;  %v1005_v63 = vld [vmem:[#allocation2 + $0xc4] sm:$0xf] }
  0xcd   : > { %471 = vst [vmem:[#allocation2 + $0xcc] sm:$0xff] %v464_v36  ;;  %v994_v38 = vld [vmem:[#allocation2 + $0x68] sm:$0xf0]  ;;  %v919_v39 = vld [vmem:[#allocation2 + $0x6c] sm:$0xf0]  ;;  %v926_v36 = vor.u32 %v995_v28, %v925_v31 }
  0xce   : > { %v918_v41 = vor.u32 %v994_v38, %v917_v34  ;;  %v922_v42 = vor.u32 %v993_v37, %v919_v39  ;;  %v992_v38 = vld [vmem:[#allocation2 + $0x58] sm:$0xf0] }
  0xd0   : > { %667 = vmatpush.bf16.msra.mxu0 %v918_v41  ;;  %693 = vmatpush.bf16.msra.mxu2 %v922_v42  ;;  %v288_v47 = vpop.permute.xlu1 %287  ;;  %v286_v48 = vpop.permute.xlu0 %285  ;;  %v1007_v59 = vld [vmem:[#allocation2 + $0xd0] sm:$0xf0] }
  0xd1   : > { %v293_v49 = vrot.slane %v288_v47, 4  ;;  %v292_v50 = vrot.slane %v286_v48, 4  ;;  %305 = vst.msk [vmem:[#allocation2 + $0x50] sm:$0xf] %vm204_vm0, %v286_v48  ;;  %v974_v4 = vor.u32 %v1007_v59, %v973_v57  ;;  %v877_v59 = vld [vmem:[#allocation2 + $0x8] sm:$0xf] }
  0xd3   : > { %v295_v54 = vsel %vm228_vm1, %v291_v40, %v292_v50  ;;  %v298_v55 = vsel %vm228_vm1, %v293_v49, %v294_v43 }
  0xd4   : > { %v297_v60 = vsel %vm296_vm7, %v1421_v58, %v295_v54  ;;  %v299_v61 = vsel %vm296_vm7, %v288_v47, %v298_v55  ;;  %v1006_v62 = vld [vmem:[#allocation2 + $0xc8] sm:$0xf0]  ;;  %v967_v0 = vld [vmem:[#allocation2 + $0xcc] sm:$0xf0]  ;;  %v889_v55 = vld [vmem:[#allocation2 + $0x20] sm:$0xf] }
  0xd5   : > { %304 = vst [vmem:[#allocation2 + $0x48] sm:$0xff] %v297_v60  ;;  %v966_v1 = vor.u32 %v1006_v62, %v965_v56  ;;  %v970_v2 = vor.u32 %v1005_v63, %v967_v0  ;;  %v983_v60 = vld [vmem:[#allocation2 + $0x10] sm:$0xf0]  ;;  %v982_v62 = vld [vmem:[#allocation2 + $0x8] sm:$0xf0] }
  0xd6   : > { %306 = vst [vmem:[#allocation2 + $0x54] sm:$0xff] %v299_v61  ;;  %v869_v61 = vld [vmem:[#allocation2] sm:$0xf]  ;;  %v981_v0 = vld [vmem:[#allocation2 + $0x4] sm:$0xf] }
  0xd7   : > { %684 = vmatpush.bf16.msra.mxu1 %v966_v1  ;;  %710 = vmatpush.bf16.msra.mxu3 %v970_v2  ;;  %v871_v1 = vld [vmem:[#allocation2 + $0xc] sm:$0xf0] }
  0xd8   : > { %v253_v58 = vpop.permute.xlu1 %252  ;;  %v251_v8 = vpop.permute.xlu0 %250  ;;  %v913_v37 = vld [vmem:[#allocation2 + $0x50] sm:$0xf] }
  0xd9   : > { %v259_v9 = vrot.slane %v253_v58, 4  ;;  %272 = vst.msk [vmem:[#allocation2 + $0x38] sm:$0xf] %vm204_vm0, %v253_v58  ;;  %v258_v10 = vrot.slane %v251_v8, 4  ;;  %v914_v39 = vor.u32 %v992_v38, %v913_v37 }
  0xda   : > { %976 = vmatmul.msk.bf16.vlgmr.msra.gmra.mxu3 %vm660_vm8, %v1462_v5  ;;  %975 = vmatmul.msk.bf16.vlgmr.msra.gmra.mxu1 %vm660_vm8, %v1462_v5 }
  0xdb   : > { %716 = vmatpush.bf16.msrb.mxu1 %v962_v3  ;;  %736 = vmatpush.bf16.msrb.mxu3 %v974_v4  ;;  %v262_v12 = vsel %vm228_vm1, %v258_v10, %v259_v9  ;;  %v874_v9 = vor.u32 %v981_v0, %v871_v1  ;;  %v513_v10 = vpack.c.b16 %v511_v6, %v511_v6 }
  0xdc   : > { %v264_v14 = vsel %vm263_vm9, %v251_v8, %v262_v12  ;;  %v905_v15 = vld [vmem:[#allocation2 + $0x48] sm:$0xf]  ;;  %v990_v16 = vld [vmem:[#allocation2 + $0x4c] sm:$0xf]  ;;  %v870_v8 = vor.u32 %v982_v62, %v869_v61 }
  0xdd   : > { %271 = vst [vmem:[#allocation2 + $0x30] sm:$0xff] %v264_v14  ;;  %v991_v18 = vld [vmem:[#allocation2 + $0x50] sm:$0xf0]  ;;  %v907_v19 = vld [vmem:[#allocation2 + $0x54] sm:$0xf0] }
  0xde   : > { %v906_v20 = vor.u32 %v991_v18, %v905_v15  ;;  %v910_v21 = vor.u32 %v990_v16, %v907_v19 }
  0xdf   : > { %717 = vmatpush.bf16.msrb.mxu1 %v950_v11 }
  0xe0   : > { %668 = vmatpush.bf16.msra.mxu0 %v906_v20  ;;  %694 = vmatpush.bf16.msra.mxu2 %v910_v21  ;;  %v257_v26 = vpop.permute.xlu0 %256  ;;  %v217_v27 = vpop.permute.xlu1 %216  ;;  %v901_v42 = vld [vmem:[#allocation2 + $0x38] sm:$0xf] }
  0xe1   : > { %v261_v29 = vrot.slane %v257_v26, 4  ;;  %274 = vst.msk [vmem:[#allocation2 + $0x44] sm:$0xf] %vm204_vm0, %v257_v26  ;;  %v224_v30 = vrot.slane %v217_v27, 4 }
  0xe3   : > { %718 = vmatpush.bf16.msrb.mxu1 %v938_v23  ;;  %v265_v32 = vsel %vm228_vm1, %v260_v22, %v261_v29  ;;  %v229_v35 = vsel %vm228_vm1, %v224_v30, %v225_v25 }
  0xe4   : > { %v266_v33 = vsel %vm263_vm9, %v1435_v24, %v265_v32  ;;  %v231_v34 = vsel %vm230_vm10, %v217_v27, %v229_v35  ;;  %v893_v48 = vld [vmem:[#allocation2 + $0x30] sm:$0xf]  ;;  %v987_v51 = vld [vmem:[#allocation2 + $0x34] sm:$0xf] }
  0xe5   : > { %273 = vst [vmem:[#allocation2 + $0x3c] sm:$0xff] %v266_v33 }
  0xe6   : > { %238 = vst [vmem:[#allocation2 + $0x18] sm:$0xff] %v231_v34 }
  0xe7   : > { %719 = vmatpush.bf16.msrb.mxu1 %v926_v36 }
  0xe8   : > { %v221_v40 = vpop.permute.xlu0 %220  ;;  %v223_v41 = vpop.permute.xlu1 %222  ;;  %v989_v43 = vld [vmem:[#allocation2 + $0x40] sm:$0xf0] }
  0xe9   : > { %v226_v45 = vrot.slane %v221_v40, 4  ;;  %v227_v46 = vrot.slane %v223_v41, 4  ;;  %241 = vst.msk [vmem:[#allocation2 + $0x2c] sm:$0xf] %vm204_vm0, %v223_v41  ;;  %v902_v47 = vor.u32 %v989_v43, %v901_v42 }
  0xea   : > { %977 = vmatmul.msk.bf16.vlgmr.msrb.gmra.mxu3 %vm660_vm8, %v1462_v5  ;;  %v878_v5 = vor.u32 %v983_v60, %v877_v59 }
  0xeb   : > { %720 = vmatpush.bf16.msrb.mxu1 %v914_v39  ;;  %v232_v24 = vsel %vm228_vm1, %v226_v45, %v227_v46 }
  0xec   : > { %v233_v49 = vsel %vm230_vm10, %v221_v40, %v232_v24  ;;  %v988_v50 = vld [vmem:[#allocation2 + $0x38] sm:$0xf0]  ;;  %v895_v52 = vld [vmem:[#allocation2 + $0x3c] sm:$0xf0] }
  0xed   : > { %240 = vst [vmem:[#allocation2 + $0x24] sm:$0xff] %v233_v49  ;;  %v894_v53 = vor.u32 %v988_v50, %v893_v48  ;;  %v898_v54 = vor.u32 %v987_v51, %v895_v52  ;;  %v881_v63 = vld [vmem:[#allocation2 + $0x18] sm:$0xf]  ;;  %v984_v3 = vld [vmem:[#allocation2 + $0x1c] sm:$0xf] }
  0xef   : > { %721 = vmatpush.bf16.msrb.mxu1 %v902_v47  ;;  %669 = vmatpush.bf16.msra.mxu0 %v894_v53 }
  0xf0   : > { %695 = vmatpush.bf16.msra.mxu2 %v898_v54  ;;  %v986_v56 = vld [vmem:[#allocation2 + $0x28] sm:$0xf0] }
  0xf1   : > { %v890_v57 = vor.u32 %v986_v56, %v889_v55 }
  0xf3   : > { %722 = vmatpush.bf16.msrb.mxu1 %v890_v57 }
  0xf4   : > { %v985_v2 = vld [vmem:[#allocation2 + $0x20] sm:$0xf0]  ;;  %v883_v4 = vld [vmem:[#allocation2 + $0x24] sm:$0xf0] }
  0xf5   : > { %v882_v7 = vor.u32 %v985_v2, %v881_v63  ;;  %v886_v58 = vor.u32 %v984_v3, %v883_v4 }
  0xf7   : > { %670 = vmatpush.bf16.msra.mxu0 %v882_v7  ;;  %696 = vmatpush.bf16.msra.mxu2 %v886_v58 }
  0xf8   : > { %723 = vmatpush.bf16.msrb.mxu1 %v878_v5 }
  0xfb   : > { %671 = vmatpush.bf16.msra.mxu0 %v870_v8  ;;  %697 = vmatpush.bf16.msra.mxu2 %v874_v9 }
  0xfc   : > { %724 = vmatmul.bf16.vlgmr.msrb.gmra.mxu1 %v513_v10 }
  0xfe   : > { %672 = vmatmul.bf16.vlgmr.msra.gmra.mxu0 %v513_v10  ;;  %698 = vmatmul.bf16.vlgmr.msra.gmra.mxu2 %v513_v10 }
 0x157   : > { %v686_v11 = vpop.f32.mrf.mxu1 }
 0x15d   : > { %v712_v12 = vpop.f32.mrf.mxu3 }
 0x15f   : > { %v688_v13 = vpop.f32.mrf.mxu1 }
 0x165   : > { %v714_v14 = vpop.f32.mrf.mxu3 }
 0x16d   : > { %v738_v44 = vpop.f32.mrf.mxu3 }
 0x175   : > { %v740_v15 = vpop.f32.mrf.mxu3 }
 0x179   : > { %v725_v16 = vpop.f32.mrf.mxu1 }
 0x17a   : > { %v739_v17 = vadd.f32 %v738_v44, %v725_v16 }
 0x17b   : > { %v673_v18 = vpop.f32.mrf.mxu0 }
 0x17c   : > { %v743_v19 = vpack.c.bf16 %v739_v17, %v739_v17  ;;  %v687_v22 = vadd.f32 %v686_v11, %v673_v18 }
 0x17e   : > { %745 = vst.msk [vmem:[%s196_s24 + $0x8] sm:$0xf] %vm204_vm0, %v743_v19 }
 0x181   : > { %v699_v20 = vpop.f32.mrf.mxu2  ;;  %v727_v21 = vpop.f32.mrf.mxu1 }
 0x182   : > { %v713_v23 = vadd.f32 %v712_v12, %v699_v20 }
 0x183   : > { %v675_v25 = vpop.f32.mrf.mxu0 }
 0x184   : > { %v742_v26 = vpack.c.bf16 %v713_v23, %v687_v22 }
 0x186   : > { %744 = vst [vmem:[%s196_s24] sm:$0xff] %v742_v26 }
 0x187   : > { %1183 = shalt.err (!%p1180_p1)
}
 0x188   : > { %1019 = dma.vmem_to_hbm [thread:$0]  (%p1322_p8), %s763_s4, 192, %s765_s17, %s747_s12  }
 0x189   : > { %v701_v27 = vpop.f32.mrf.mxu2 }
 0x18a PF: > { %s776_s5 = sand.u32 1, %s1222_s9   ;;  %p1030_p2 = pnand %p863_p13, %p1326_p9 }
 0x18b   : > { %s777_s8 = scalar_lea.sflag [#allocation5], %s776_s5 }
 0x18c   : > { %p1031_p4 = pneg %p1030_p2 }
 0x18e   : > { %1217 = dma.done.wait (%p1031_p4), %s777_s8, 192  }
 0x18f   : > { %1219 = vsyncadd (%p1031_p4), %s777_s8, 4294967104  ;;  %s19_s14 = sadd.s32 1, %s1242_s14   ;;  %s1535_s9 = smov %s1226_s10 }
 0x190   : > { %p16_p6 = scmp.ge.s32.totalorder %s19_s14, 4   ;;  %s1536_s10 = smov %s1230_s11 }
 0x191   : > { %s1537_s11 = smov %s1364_s23  ;;  %s1538_s12 = smov %s1238_s13 }
 0x192   : > { %s1539_s13 = smov %s1541_s30  ;;  %18 = sbr.rel (!%p16_p6) target bundleno = 7 (0x7), region = 77 }
 0x197   :  { %783 = vsyncpa [#allocation4], 1 }
 0x198   :  { %785 = vsyncpa [#allocation4 + $0x1], 1 }
 0x199   :  { %786 = vsyncpa [#allocation7], 1 }
 0x19a   :  { %787 = vsyncpa [#allocation5], 1 }
 0x19b   :  { %789 = vsyncpa [#allocation5 + $0x1], 1 }

</bundles_post_ra>
